<compile_context>
chip_gen: v7x
topology: tpu7x:2x2x1
jax: 0.10.0
libtpu: 0.0.40
codegen_flags: <defaults>
</compile_context>

<pallas_src>
import functools

import jax
import jax.numpy as jnp
from jax.experimental import pallas as pl
from jax.experimental.pallas import tpu as pltpu

# Module hyper-parameters (defaults from FocalLoss.__init__)
ALPHA = 1.0
GAMMA = 0.0
EPS = 1e-7  # defined in __init__ but unused by the forward pass


def _round_up(x, m):
    return (x + m - 1) // m * m


def _choose_tile_rows(n, c, vmem_budget_bytes=24 * 1024 * 1024, max_rows=1024):
    """Largest row-tile (multiple of 8) whose double-buffered footprint fits budget."""
    if n < 8:
        return int(n)  # single exact block (block dim == full array dim is allowed)
    c_lanes = _round_up(max(c, 1), 128)
    # 2 buffers x logits tile  +  2 buffers x lane-padded (TN,1) int32 target tile
    bytes_per_row = 2 * c_lanes * 4 + 2 * 128 * 4
    tn = vmem_budget_bytes // bytes_per_row
    tn = max(8, min(max_rows, (tn // 8) * 8))
    tn = min(tn, (n // 8) * 8)  # never exceed the array (trailing partial block is fine)
    return int(tn)


def _ce_partial_sum_kernel(x_ref, t_ref, out_ref, *, n_total):
    """Per-block partial sum of per-sample cross entropy (stable log-softmax)."""
    pid = pl.program_id(0)
    x = x_ref[...].astype(jnp.float32)          # (TN, C) logits
    t = t_ref[...]                              # (TN, 1) int32 targets
    tn, c = x.shape

    # stable log-softmax per row
    m = jnp.max(x, axis=-1, keepdims=True)                              # (TN, 1)
    shifted = x - m                                                     # (TN, C)
    lse = jnp.log(jnp.sum(jnp.exp(shifted), axis=-1, keepdims=True))    # (TN, 1)

    # gather the target-class logit via a one-hot mask (VPU-friendly)
    col = jax.lax.broadcasted_iota(jnp.int32, (tn, c), 1)
    onehot = (col == t).astype(jnp.float32)                             # (TN, C)
    x_tgt = jnp.sum(shifted * onehot, axis=-1, keepdims=True)           # (TN, 1)

    ce = lse - x_tgt                                                    # (TN, 1)

    # mask rows beyond the true batch size (trailing partial block)
    row = pid * tn + jax.lax.broadcasted_iota(jnp.int32, (tn, 1), 0)
    ce = jnp.where(row < n_total, ce, 0.0)

    partial = jnp.sum(ce)                                               # scalar
    # lane-dense (1, 8, 128) broadcast store -> unmasked vst
    out_ref[...] = jnp.broadcast_to(partial, out_ref.shape).astype(out_ref.dtype)


def focal_loss(logits, target, *, alpha=ALPHA, gamma=GAMMA):
    n, c = logits.shape
    x = logits.astype(jnp.float32)
    t = target.reshape(n, 1).astype(jnp.int32)

    tn = _choose_tile_rows(n, c)
    num_blocks = pl.cdiv(n, tn)

    kernel = functools.partial(_ce_partial_sum_kernel, n_total=n)

    partial_slab = pl.pallas_call(
        kernel,
        grid=(num_blocks,),
        in_specs=[
            pl.BlockSpec((tn, c), lambda i: (i, 0)),   # logits tile
            pl.BlockSpec((tn, 1), lambda i: (i, 0)),   # target column tile
        ],
        out_specs=pl.BlockSpec((1, 8, 128), lambda i: (i, 0, 0)),
        out_shape=jax.ShapeDtypeStruct((num_blocks, 8, 128), jnp.float32),
        compiler_params=pltpu.CompilerParams(
            dimension_semantics=("parallel",),          # both v7x TCs stream HBM
            vmem_limit_bytes=32 * 1024 * 1024,          # safe on v5e/v6e/v7x
        ),
    )(x, t)

    # --- tiny scalar epilogue (kept out of the kernel per perf review) ----
    mean_ce = jnp.sum(partial_slab[:, 0, 0]) / jnp.float32(n)   # reduction='mean'
    p = jnp.exp(-mean_ce)
    if gamma == 0:
        focal_factor = 1.0                                      # folded at trace time
    elif float(gamma).is_integer():
        focal_factor = (1.0 - p) ** int(gamma)                  # integer_pow, no log/exp
    else:
        focal_factor = (1.0 - p) ** gamma
    loss = alpha * focal_factor * mean_ce
    return loss                                                 # loss.mean() of a scalar


def focal_loss_ref(logits, target, alpha=ALPHA, gamma=GAMMA):
    # pure-JAX reference (mirrors torch.nn.CrossEntropyLoss + focal formula)
    logp_all = jax.nn.log_softmax(logits.astype(jnp.float32), axis=-1)
    ce = -jnp.take_along_axis(logp_all, target[:, None].astype(jnp.int32), axis=-1)[:, 0]
    logp = jnp.mean(ce)
    p = jnp.exp(-logp)
    return alpha * (1.0 - p) ** gamma * logp


if __name__ == "__main__":
    key = jax.random.PRNGKey(0)

    # Case 1: small aligned batch (module expects (N, C) logits + (N,) class ids)
    k1, k2 = jax.random.split(key)
    N, C = 8, 32
    x = jax.random.normal(k1, (N, C), dtype=jnp.float32)
    t = jax.random.randint(k2, (N,), 0, C, dtype=jnp.int32)
    out = jax.block_until_ready(focal_loss(x, t))
    ref = focal_loss_ref(x, t)
    assert jnp.isfinite(out), "kernel produced non-finite loss"
    assert jnp.allclose(out, ref, rtol=1e-5, atol=1e-5), (out, ref)

    # Case 2: batch not a multiple of the row tile -> exercises the padded-row mask
    k3, k4 = jax.random.split(k2)
    N2, C2 = 30, 32
    x2 = jax.random.normal(k3, (N2, C2), dtype=jnp.float32)
    t2 = jax.random.randint(k4, (N2,), 0, C2, dtype=jnp.int32)
    out2 = jax.block_until_ready(focal_loss(x2, t2))
    ref2 = focal_loss_ref(x2, t2)
    assert jnp.isfinite(out2), "kernel produced non-finite loss (case 2)"
    assert jnp.allclose(out2, ref2, rtol=1e-5, atol=1e-5), (out2, ref2)

    print("KERNEL_OK")
</pallas_src>

<mosaic_0001>
module attributes {stable_mosaic.version = 11 : i64} {
  func.func @_ce_partial_sum_kernel(%arg0: i32, %arg1: memref<8x32xf32, #tpu.memory_space<vmem>>, %arg2: memref<8x1xi32, #tpu.memory_space<vmem>>, %arg3: memref<1x8x128xf32, #tpu.memory_space<vmem>>) attributes {dimension_semantics = [#tpu.dimension_semantics<parallel>], iteration_bounds = array<i64: 1>, scalar_prefetch = 0 : i64, scratch_operands = 0 : i64, tpu.core_type = #tpu.core_type<tc>, window_params = [{transform_indices = @transform_0, window_bounds = array<i64: 8, 32>}, {transform_indices = @transform_1, window_bounds = array<i64: 8, 1>}, {transform_indices = @transform_2, window_bounds = array<i64: 1, 8, 128>}]} {
    %c0 = arith.constant 0 : index
    %c0_0 = arith.constant 0 : index
    %0 = vector.load %arg1[%c0, %c0_0] : memref<8x32xf32, #tpu.memory_space<vmem>>, vector<8x32xf32>
    %c0_1 = arith.constant 0 : index
    %c0_2 = arith.constant 0 : index
    %1 = vector.load %arg2[%c0_1, %c0_2] : memref<8x1xi32, #tpu.memory_space<vmem>>, vector<8x1xi32>
    %cst = arith.constant dense<0xFF800000> : vector<8xf32>
    %2 = vector.multi_reduction <maximumf>, %0, %cst [1] : vector<8x32xf32> to vector<8xf32>
    %3 = vector.shape_cast %2 : vector<8xf32> to vector<8x1xf32>
    %4 = vector.broadcast %3 : vector<8x1xf32> to vector<8x32xf32>
    %5 = arith.subf %0, %4 : vector<8x32xf32>
    %6 = math.exp %5 : vector<8x32xf32>
    %cst_3 = arith.constant dense<0.000000e+00> : vector<8xf32>
    %7 = vector.multi_reduction <add>, %6, %cst_3 [1] : vector<8x32xf32> to vector<8xf32>
    %8 = vector.shape_cast %7 : vector<8xf32> to vector<8x1xf32>
    %9 = math.log %8 : vector<8x1xf32>
    %10 = tpu.iota {dimensions = array<i32: 1>} : vector<8x32xi32>
    %11 = vector.broadcast %1 : vector<8x1xi32> to vector<8x32xi32>
    %12 = arith.cmpi eq, %10, %11 : vector<8x32xi32>
    %13 = arith.extui %12 : vector<8x32xi1> to vector<8x32xi32>
    %14 = arith.sitofp %13 : vector<8x32xi32> to vector<8x32xf32>
    %15 = arith.mulf %5, %14 : vector<8x32xf32>
    %cst_4 = arith.constant dense<0.000000e+00> : vector<8xf32>
    %16 = vector.multi_reduction <add>, %15, %cst_4 [1] : vector<8x32xf32> to vector<8xf32>
    %17 = vector.shape_cast %16 : vector<8xf32> to vector<8x1xf32>
    %18 = arith.subf %9, %17 : vector<8x1xf32>
    %c8_i32 = arith.constant 8 : i32
    %19 = arith.muli %arg0, %c8_i32 : i32
    %20 = tpu.iota {dimensions = array<i32: 0>} : vector<8x1xi32>
    %21 = vector.broadcast %19 : i32 to vector<8x1xi32>
    %22 = arith.addi %21, %20 : vector<8x1xi32>
    %c8_i32_5 = arith.constant 8 : i32
    %23 = vector.broadcast %c8_i32_5 : i32 to vector<8x1xi32>
    %24 = arith.cmpi slt, %22, %23 : vector<8x1xi32>
    %cst_6 = arith.constant 0.000000e+00 : f32
    %25 = vector.broadcast %cst_6 : f32 to vector<8x1xf32>
    %26 = arith.select %24, %18, %25 : vector<8x1xi1>, vector<8x1xf32>
    %27 = vector.shape_cast %26 : vector<8x1xf32> to vector<1x8x1xf32>
    %cst_7 = arith.constant dense<0.000000e+00> : vector<1xf32>
    %28 = vector.multi_reduction <add>, %27, %cst_7 [1, 2] : vector<1x8x1xf32> to vector<1xf32>
    %29 = vector.shape_cast %28 : vector<1xf32> to vector<1x1x1xf32>
    %30 = vector.extract %29[0, 0, 0] : f32 from vector<1x1x1xf32>
    %31 = vector.broadcast %30 : f32 to vector<1x8x128xf32>
    %c0_8 = arith.constant 0 : index
    %c0_9 = arith.constant 0 : index
    %c0_10 = arith.constant 0 : index
    %32 = vector.load %arg3[%c0_8, %c0_9, %c0_10] : memref<1x8x128xf32, #tpu.memory_space<vmem>>, vector<1x8x128xf32>
    tpu.vector_store %arg3[%c0_8, %c0_9, %c0_10], %31 {strides = array<i32>} : memref<1x8x128xf32, #tpu.memory_space<vmem>>, vector<1x8x128xf32>,
    return
  }
  func.func @transform_0(%arg0: i32) -> (i32, i32) {
    %c0_i32 = arith.constant 0 : i32
    %c0_i32_0 = arith.constant 0 : i32
    return %arg0, %c0_i32 : i32, i32
  }
  func.func @transform_1(%arg0: i32) -> (i32, i32) {
    %c0_i32 = arith.constant 0 : i32
    %c0_i32_0 = arith.constant 0 : i32
    return %arg0, %c0_i32 : i32, i32
  }
  func.func @transform_2(%arg0: i32) -> (i32, i32, i32) {
    %c0_i32 = arith.constant 0 : i32
    %c0_i32_0 = arith.constant 0 : i32
    %c0_i32_1 = arith.constant 0 : i32
    return %arg0, %c0_i32, %c0_i32_0 : i32, i32, i32
  }
}

</mosaic_0001>

<bundles_post_ra>
// kernel: tpu_custom_call.1
= control target key start
LH: loop header
LB: loop body
LE: loop exit
PB: predicated region body
PF: predicated region fallthrough
CT: control target
= control target key end

     0   :  { %vm14_vm0 = vcmask 261120   ;;  %s147_s0 = inlined_call_operand.vmem [shape: f32[8,32], index: 0, kind: input, shape index: {}]   ;;  %s148_s1 = inlined_call_operand.vmem [shape: s32[8,1], index: 1, kind: input, shape index: {}]   ;;  %s149_s2 = inlined_call_operand.hbm [shape: f32[1,8,128], index: 2, kind: output, shape index: {}]  }
   0x1   :  { %v12_v0 = vld [vmem:[%s147_s0] sm:$0xff] }
   0x2   :  { %7 = vsyncpa [#allocation3], 0  ;;  %v15_v1 = vsel %vm14_vm0, %v12_v0, -inf  ;;  %v108_v2 = vmov 0   ;;  %v13_v3 = vld [vmem:[%s148_s1] sm:$0xff]  ;;  %v26_v6 = vlaneseq  ;;  %v109_v10 = vmov 0.0  }
   0x3   :  { %79 = vset.pattern.permute.xlu0 %v108_v2  ;;  %vm46_vm2 = vcmask 7168   ;;  %s110_s0 = smov [#allocation2]  }
   0x4   :  { %16 = vmax.xlane.f32.xlu0 %v15_v1  ;;  %v27_v8 = vand.u32 127, %v26_v6  ;;  %s65_s1 = sshll.u32 %s110_s0, 4  ;;  %s66_s1 = int_to_ptr.vmem [resolvable:$true] %s65_s1 }
   0x5   :  { %s84_s14 = scalar_lea.vmem %s66_s1, 128  ;;  %p89_p1 = scmp.lt.s32.totalorder %s66_s1, %s66_s1 }
   0x6   :  { %p85_p0 = scmp.ne.s32.totalorder %s66_s1, %s84_s14  ;;  %p90_p2 = scmp.lt.s32.totalorder %s84_s14, %s84_s14 }
   0x8   :  { %p91_p3 = por %p90_p2, %p89_p1 }
   0xa   :  { %p92_p4 = pnand %p91_p3, %p85_p0 }
  0x1a   :  { %29 = vperm.xlu0 %79, %v13_v3  }
  0x91   :  { %v17_v4 = vpop.xlane.xlu0 %16 }
  0x92   :  { %v18_v5 = vsub.f32 %v12_v0, %v17_v4 }
  0x94   :  { %v19_v7 = vmul.f32 1.442695, %v18_v5 }
  0x96   :  { %80 = vpow2.f32 %v19_v7 }
  0x99   :  { %v30_v9 = vpop.permute.xlu0 %29 }
  0x9a   :  { %vm31_vm1 = vcmp.eq.s32.totalorder %v27_v8, %v30_v9 }
  0x9b   :  { %v73_v11 = vsel %vm31_vm1, 1.0, %v109_v10 }
  0x9c   :  { %v34_v14 = vmul.f32 %v73_v11, %v18_v5 }
  0x9e   :  { %v35_v15 = vsel %vm14_vm0, %v34_v14, 0.0 }
  0xa0   :  { %v81_v12 = vpop.eup %80 }
  0xa1   :  { %v21_v13 = vsel %vm14_vm0, %v81_v12, 0.0 }
  0xa2   :  { %22 = vadd.xlane.f32.xlu1 %v21_v13 }
  0xa6   :  { %36 = vadd.xlane.f32.xlu1 %v35_v15 }
 0x12f   :  { %v23_v16 = vpop.xlane.xlu1 %22 }
 0x130   :  { %82 = vlog2.f32 %v23_v16 }
 0x133   :  { %v37_v19 = vpop.xlane.xlu1 %36 }
 0x13a   :  { %v83_v17 = vpop.eup %82 }
 0x13b   :  { %v25_v18 = vmul.f32 0.6931472, %v83_v17 }
 0x13d   :  { %v38_v20 = vsub.f32 %v25_v18, %v37_v19 }
 0x13f   :  { %v47_v21 = vsel %vm46_vm2, %v38_v20, 0.0 }
 0x140   :  { %48 = vadd.xlane.f32.xlu1 %v47_v21 }
 0x1cd   :  { %v49_v22 = vpop.xlane.xlu1 %48 }
 0x1ce   :  { %v50_v23 = vrot.slane %v49_v22, 4 }
 0x1d0   :  { %v51_v24 = vadd.f32 %v50_v23, %v49_v22 }
 0x1d2   :  { %v52_v25 = vrot.slane %v51_v24, 2 }
 0x1d4   :  { %v53_v26 = vadd.f32 %v52_v25, %v51_v24 }
 0x1d6   :  { %v54_v27 = vrot.slane %v53_v26, 1 }
 0x1d8   :  { %v55_v28 = vadd.f32 %v54_v27, %v53_v26 }
 0x1da   :  { %74 = vpush %v55_v28 }
 0x20b   :  { %s75_s13 = spop %74 }
 0x20c   :  { %v57_v29 = vstv %s75_s13 }
 0x20d   :  { %58 = vst [vmem:[#allocation2] sm:$0xff] %v57_v29 }
 0x20e   :  { %95 = shalt.err (!%p92_p4)
}
 0x20f   :  { %s96_s17 = scalar_lea.hbm %s149_s2, 128 }
 0x210   :  { %p97_p5 = scmp.ne.s32.totalorder %s149_s2, %s96_s17  ;;  %p100_p6 = scmp.lt.u32.totalorder %s96_s17, %s149_s2 }
 0x212   :  { %p102_p7 = pnand %p100_p6, %p97_p5 }
 0x214   :  { %105 = shalt.err (!%p102_p7)
}
 0x215   :  { %68 = dma.vmem_to_hbm [thread:$0]  %s66_s1, 128, %s149_s2, [#allocation3]  }
 0x216   :  { %106 = dma.done.wait [#allocation3], 128  }
 0x217   :  { %107 = vsyncadd [#allocation3], 4294967168 }
 0x218   :  { %72 = vsyncpa [#allocation3], 1 }

</bundles_post_ra>
